<compile_context>
chip_gen: v7x
topology: tpu7x:2x2x1
jax: 0.10.0
libtpu: 0.0.40
codegen_flags: <defaults>
</compile_context>

<pallas_src>
import math
import functools

import jax
import jax.numpy as jnp
from jax import lax
from jax.experimental import pallas as pl
from jax.experimental.pallas import tpu as pltpu


NEG_INF = -1e18


def _round_up(x, m):
    return ((x + m - 1) // m) * m


def _pick_tile(dim, target):
    """Tile of `target` when the dim is large enough, else the full dim
    (full-dim blocks are always layout-legal and need no padding)."""
    return target if dim >= target else dim


# ----------------------------------------------------------------------------
# Tiled linear kernel: y = x @ W + b   (W stored as (in_features, out_features))
# ----------------------------------------------------------------------------
def _linear_kernel(x_ref, w_ref, b_ref, o_ref, acc_ref):
    k = pl.program_id(2)

    @pl.when(k == 0)
    def _():
        acc_ref[...] = jnp.zeros(acc_ref.shape, acc_ref.dtype)

    acc_ref[...] += jnp.dot(x_ref[...], w_ref[...],
                            preferred_element_type=jnp.float32)

    @pl.when(k == pl.num_programs(2) - 1)
    def _():
        o_ref[...] = (acc_ref[...] + b_ref[...].astype(jnp.float32)
                      ).astype(o_ref.dtype)


def linear(x2d, w, b, *, tm=256, tn=256, tk=512):
    """Tiled, pipelined y = x2d @ w + b for arbitrary (M, K, N); pads internally."""
    M, K = x2d.shape
    K2, N = w.shape
    assert K == K2
    tm = _pick_tile(M, tm)
    tk = _pick_tile(K, tk)
    tn = _pick_tile(N, tn)
    Mp, Kp, Np = _round_up(M, tm), _round_up(K, tk), _round_up(N, tn)

    xp = x2d if (Mp == M and Kp == K) else jnp.pad(x2d, ((0, Mp - M), (0, Kp - K)))
    wp = w if (Kp == K and Np == N) else jnp.pad(w, ((0, Kp - K), (0, Np - N)))
    bp = (b if Np == N else jnp.pad(b, (0, Np - N))).reshape(1, Np)

    out = pl.pallas_call(
        _linear_kernel,
        grid=(Mp // tm, Np // tn, Kp // tk),
        in_specs=[
            pl.BlockSpec((tm, tk), lambda i, j, k: (i, k)),
            pl.BlockSpec((tk, tn), lambda i, j, k: (k, j)),
            pl.BlockSpec((1, tn), lambda i, j, k: (0, j)),
        ],
        out_specs=pl.BlockSpec((tm, tn), lambda i, j, k: (i, j)),
        out_shape=jax.ShapeDtypeStruct((Mp, Np), x2d.dtype),
        scratch_shapes=[pltpu.VMEM((tm, tn), jnp.float32)],
        compiler_params=pltpu.CompilerParams(
            dimension_semantics=("parallel", "parallel", "arbitrary")),
    )(xp, wp, bp)
    if Mp != M or Np != N:
        out = out[:M, :N]
    return out


# ----------------------------------------------------------------------------
# Flash-style attention core: online softmax over Lk tiles, ctx output only.
#   grid = (B, H, Lq//tq, Lk//tk), reduction axis (Lk) last / "arbitrary".
# ----------------------------------------------------------------------------
def _flash_kernel(*refs, use_mask):
    if use_mask:
        q_ref, k_ref, v_ref, mask_ref, o_ref, m_sc, l_sc, acc_sc = refs
    else:
        q_ref, k_ref, v_ref, o_ref, m_sc, l_sc, acc_sc = refs
        mask_ref = None

    ki = pl.program_id(3)

    @pl.when(ki == 0)
    def _():
        m_sc[...] = jnp.full(m_sc.shape, -jnp.inf, m_sc.dtype)
        l_sc[...] = jnp.zeros(l_sc.shape, l_sc.dtype)
        acc_sc[...] = jnp.zeros(acc_sc.shape, acc_sc.dtype)

    # scores = (q_scaled) @ k^T without an explicit transpose: contract last dims.
    s = lax.dot_general(q_ref[...], k_ref[...], (((1,), (1,)), ((), ())),
                        preferred_element_type=jnp.float32)
    if use_mask:
        s = jnp.where(mask_ref[...] != 0, NEG_INF, s)      # masked_fill semantics

    m_prev = m_sc[...]
    m_new = jnp.maximum(m_prev, jnp.max(s, axis=-1, keepdims=True))
    alpha = jnp.exp(m_prev - m_new)
    p = jnp.exp(s - m_new)
    l_sc[...] = alpha * l_sc[...] + jnp.sum(p, axis=-1, keepdims=True)
    acc_sc[...] = alpha * acc_sc[...] + jnp.dot(
        p.astype(v_ref.dtype), v_ref[...], preferred_element_type=jnp.float32)
    m_sc[...] = m_new
    # TODO(synk): training-mode dropout on attention weights not implemented (eval path).

    @pl.when(ki == pl.num_programs(3) - 1)
    def _():
        inv_l = pl.reciprocal(l_sc[...])                    # EUP, not Lq*Lk divides
        o_ref[...] = (acc_sc[...] * inv_l).astype(o_ref.dtype)


def flash_attention(q, k, v, mask_i8, *, tq, tk):
    """q: (B,H,Lqp,d) already scaled; k/v: (B,H,Lkp,d); mask_i8: (B,Lqp,Lkp) or None."""
    B, H, Lqp, d = q.shape
    Lkp = k.shape[2]
    use_mask = mask_i8 is not None
    kern = functools.partial(_flash_kernel, use_mask=use_mask)

    in_specs = [
        pl.BlockSpec((None, None, tq, d), lambda b, h, qi, ki: (b, h, qi, 0)),
        pl.BlockSpec((None, None, tk, d), lambda b, h, qi, ki: (b, h, ki, 0)),
        pl.BlockSpec((None, None, tk, d), lambda b, h, qi, ki: (b, h, ki, 0)),
    ]
    ins = [q, k, v]
    if use_mask:
        in_specs.append(
            pl.BlockSpec((None, tq, tk), lambda b, h, qi, ki: (b, qi, ki)))
        ins.append(mask_i8)

    return pl.pallas_call(
        kern,
        grid=(B, H, Lqp // tq, Lkp // tk),
        in_specs=in_specs,
        out_specs=pl.BlockSpec((None, None, tq, d),
                               lambda b, h, qi, ki: (b, h, qi, 0)),
        out_shape=jax.ShapeDtypeStruct((B, H, Lqp, d), q.dtype),
        scratch_shapes=[
            pltpu.VMEM((tq, 1), jnp.float32),   # running max
            pltpu.VMEM((tq, 1), jnp.float32),   # running denom
            pltpu.VMEM((tq, d), jnp.float32),   # ctx accumulator
        ],
        compiler_params=pltpu.CompilerParams(
            dimension_semantics=("parallel", "parallel", "parallel", "arbitrary")),
    )(*ins)


# ----------------------------------------------------------------------------
# top_attn: softmax attention map of head 0 only (what the module returns).
# ----------------------------------------------------------------------------
def _head0_attn_kernel(*refs, use_mask):
    if use_mask:
        q_ref, k_ref, mask_ref, attn_ref = refs
    else:
        q_ref, k_ref, attn_ref = refs
        mask_ref = None
    s = lax.dot_general(q_ref[...], k_ref[...], (((1,), (1,)), ((), ())),
                        preferred_element_type=jnp.float32)
    if use_mask:
        s = jnp.where(mask_ref[...] != 0, NEG_INF, s)
    m = jnp.max(s, axis=-1, keepdims=True)
    e = jnp.exp(s - m)
    inv = pl.reciprocal(jnp.sum(e, axis=-1, keepdims=True))
    attn_ref[...] = (e * inv).astype(attn_ref.dtype)


def head0_attention_map(q, k, mask_i8, *, tq):
    B, H, Lqp, d = q.shape
    Lkp = k.shape[2]
    use_mask = mask_i8 is not None
    kern = functools.partial(_head0_attn_kernel, use_mask=use_mask)
    in_specs = [
        pl.BlockSpec((None, None, tq, d), lambda b, qi: (b, 0, qi, 0)),
        pl.BlockSpec((None, None, Lkp, d), lambda b, qi: (b, 0, 0, 0)),
    ]
    ins = [q, k]
    if use_mask:
        in_specs.append(pl.BlockSpec((None, tq, Lkp), lambda b, qi: (b, qi, 0)))
        ins.append(mask_i8)
    return pl.pallas_call(
        kern,
        grid=(B, Lqp // tq),
        in_specs=in_specs,
        out_specs=pl.BlockSpec((None, tq, Lkp), lambda b, qi: (b, qi, 0)),
        out_shape=jax.ShapeDtypeStruct((B, Lqp, Lkp), q.dtype),
        compiler_params=pltpu.CompilerParams(
            dimension_semantics=("parallel", "parallel")),
    )(*ins)


# ----------------------------------------------------------------------------
# MultiHeadedAttention forward (layer_cache=None, max_relative_positions=0)
# ----------------------------------------------------------------------------
def multi_headed_attention(params, key, value, query, mask=None):
    B, Lq, D = query.shape
    Lk = key.shape[1]
    H = params["head_count"]
    d = D // H
    scale = 1.0 / math.sqrt(d)

    # Fold 1/sqrt(d) query scaling into the Q projection.
    wq, bq = params["wq"] * scale, params["bq"] * scale

    # Fuse projections that share the same input tensor into a single MXU pass.
    if (query is key) and (key is value):
        qkv = linear(query.reshape(B * Lq, D),
                     jnp.concatenate([wq, params["wk"], params["wv"]], axis=1),
                     jnp.concatenate([bq, params["bk"], params["bv"]]))
        q = qkv[:, :D].reshape(B, Lq, D)
        k = qkv[:, D:2 * D].reshape(B, Lq, D)
        v = qkv[:, 2 * D:].reshape(B, Lq, D)
    elif key is value:
        q = linear(query.reshape(B * Lq, D), wq, bq).reshape(B, Lq, D)
        kv = linear(key.reshape(B * Lk, D),
                    jnp.concatenate([params["wk"], params["wv"]], axis=1),
                    jnp.concatenate([params["bk"], params["bv"]]))
        k = kv[:, :D].reshape(B, Lk, D)
        v = kv[:, D:].reshape(B, Lk, D)
    else:
        q = linear(query.reshape(B * Lq, D), wq, bq).reshape(B, Lq, D)
        k = linear(key.reshape(B * Lk, D), params["wk"], params["bk"]).reshape(B, Lk, D)
        v = linear(value.reshape(B * Lk, D), params["wv"], params["bv"]).reshape(B, Lk, D)

    # Flash tiling sizes (Lk tile >= 256 keeps the 256-wide MXU full on v6e/v7x).
    tq = _pick_tile(Lq, 128)
    tk = _pick_tile(Lk, 256)
    Lqp, Lkp = _round_up(Lq, tq), _round_up(Lk, tk)

    def pad_len(x, Lp):
        L = x.shape[1]
        return x if Lp == L else jnp.pad(x, ((0, 0), (0, Lp - L), (0, 0)))

    q, k, v = pad_len(q, Lqp), pad_len(k, Lkp), pad_len(v, Lkp)

    def heads(x):  # (B, L, D) -> (B, H, L, d)
        L = x.shape[1]
        return x.reshape(B, L, H, d).transpose(0, 2, 1, 3)
    # TODO(synk): head split/merge kept as XLA transposes; folding them into the
    # BlockSpec index maps needs sub-(8,128) minor-dim blocks.

    qh, kh, vh = heads(q), heads(k), heads(v)

    # int8 mask (nonzero = masked); also masks padded key columns.
    if mask is None and Lkp == Lk:
        mask_i8 = None
    else:
        base = (jnp.zeros((B, Lq, Lk), jnp.int8) if mask is None
                else jnp.broadcast_to(mask, (B, Lq, Lk)).astype(jnp.int8))
        mask_i8 = jnp.pad(base, ((0, 0), (0, Lqp - Lq), (0, Lkp - Lk)),
                          constant_values=1)

    ctx = flash_attention(qh, kh, vh, mask_i8, tq=tq, tk=tk)       # (B,H,Lqp,d)
    top_attn = head0_attention_map(qh, kh, mask_i8, tq=tq)         # (B,Lqp,Lkp)

    context = ctx.transpose(0, 2, 1, 3).reshape(B, Lqp, D)[:, :Lq]  # unshape
    output = linear(context.reshape(B * Lq, D),
                    params["wo"], params["bo"]).reshape(B, Lq, D)
    top_attn = top_attn[:, :Lq, :Lk]
    # TODO(synk): layer_cache ('self'/'context') and relative-position embeddings
    # (max_relative_positions > 0) are not implemented.
    return output, top_attn


def init_params(rng, head_count, model_dim, dtype=jnp.float32):
    ks = jax.random.split(rng, 8)
    s = 1.0 / math.sqrt(model_dim)

    def w(k):  # stored as (in, out) == torch weight.T
        return jax.random.uniform(k, (model_dim, model_dim), dtype, -s, s)

    def b(k):
        return jax.random.uniform(k, (model_dim,), dtype, -s, s)

    return {
        "head_count": head_count,
        "wk": w(ks[0]), "bk": b(ks[1]),
        "wv": w(ks[2]), "bv": b(ks[3]),
        "wq": w(ks[4]), "bq": b(ks[5]),
        "wo": w(ks[6]), "bo": b(ks[7]),
    }


def _reference(params, key, value, query, mask):
    """Pure-JAX reference of the PyTorch forward (eval mode, no cache)."""
    H = params["head_count"]
    B, Lq, D = query.shape
    d = D // H
    with jax.default_matmul_precision("float32"):
        k = key @ params["wk"] + params["bk"]
        v = value @ params["wv"] + params["bv"]
        q = query @ params["wq"] + params["bq"]

        def heads(x):
            return x.reshape(B, -1, H, d).transpose(0, 2, 1, 3)

        qh, kh, vh = heads(q) / math.sqrt(d), heads(k), heads(v)
        s = jnp.einsum("bhqd,bhkd->bhqk", qh, kh)
        if mask is not None:
            s = jnp.where(mask[:, None, :, :], NEG_INF, s)
        a = jax.nn.softmax(s, axis=-1)
        ctx = jnp.einsum("bhqk,bhkd->bhqd", a, vh)
        ctx = ctx.transpose(0, 2, 1, 3).reshape(B, Lq, D)
        out = ctx @ params["wo"] + params["bo"]
    return out, a[:, 0]


if __name__ == "__main__":
    head_count, model_dim = 4, 32
    B, Lq, Lk = 2, 8, 8

    root = jax.random.PRNGKey(0)
    kp, kq, kk, kv = jax.random.split(root, 4)

    params = init_params(kp, head_count, model_dim)
    query = jax.random.normal(kq, (B, Lq, model_dim), jnp.float32)
    key = jax.random.normal(kk, (B, Lk, model_dim), jnp.float32)
    value = jax.random.normal(kv, (B, Lk, model_dim), jnp.float32)

    # Padding-style mask: batch 0 masks keys 5..7, batch 1 masks nothing.
    lens = jnp.array([5, 8])
    mask = jnp.broadcast_to(
        jnp.arange(Lk)[None, None, :] >= lens[:, None, None], (B, Lq, Lk))

    # Cross-attention style (distinct q/k/v) with a mask.
    out1, attn1 = multi_headed_attention(params, key, value, query, mask=mask)
    # Self-attention style (q is k is v) — exercises the fused QKV projection.
    out2, attn2 = multi_headed_attention(params, query, query, query, mask=None)
    jax.block_until_ready((out1, attn1, out2, attn2))

    assert out1.shape == (B, Lq, model_dim) and attn1.shape == (B, Lq, Lk)
    assert out2.shape == (B, Lq, model_dim) and attn2.shape == (B, Lq, Lq)

    r_out1, r_attn1 = _reference(params, key, value, query, mask)
    r_out2, r_attn2 = _reference(params, query, query, query, None)
    assert jnp.allclose(out1, r_out1, atol=1e-3, rtol=1e-3)
    assert jnp.allclose(attn1, r_attn1, atol=1e-3, rtol=1e-3)
    assert jnp.allclose(out2, r_out2, atol=1e-3, rtol=1e-3)
    assert jnp.allclose(attn2, r_attn2, atol=1e-3, rtol=1e-3)

    print("KERNEL_OK")
</pallas_src>

<mosaic_0001>
module attributes {stable_mosaic.version = 11 : i64} {
  func.func @_linear_kernel(%arg0: i32, %arg1: i32, %arg2: i32, %arg3: memref<16x32xf32, #tpu.memory_space<vmem>>, %arg4: memref<32x32xf32, #tpu.memory_space<vmem>>, %arg5: memref<1x32xf32, #tpu.memory_space<vmem>>, %arg6: memref<16x32xf32, #tpu.memory_space<vmem>>, %arg7: memref<16x32xf32, #tpu.memory_space<vmem>>) attributes {dimension_semantics = [#tpu.dimension_semantics<parallel>, #tpu.dimension_semantics<parallel>, #tpu.dimension_semantics<arbitrary>], iteration_bounds = array<i64: 1, 1, 1>, scalar_prefetch = 0 : i64, scratch_operands = 1 : i64, tpu.core_type = #tpu.core_type<tc>, window_params = [{transform_indices = @transform_0, window_bounds = array<i64: 16, 32>}, {transform_indices = @transform_1, window_bounds = array<i64: 32, 32>}, {transform_indices = @transform_2, window_bounds = array<i64: 1, 32>}, {transform_indices = @transform_3, window_bounds = array<i64: 16, 32>}]} {
    %c0_i32 = arith.constant 0 : i32
    %0 = arith.cmpi eq, %arg2, %c0_i32 : i32
    %1 = arith.extui %0 : i1 to i32
    %c0_i32_0 = arith.constant 0 : i32
    %2 = arith.cmpi ne, %1, %c0_i32_0 : i32
    scf.if %2 {
      %cst_10 = arith.constant 0.000000e+00 : f32
      %12 = vector.broadcast %cst_10 : f32 to vector<16x32xf32>
      %c0_11 = arith.constant 0 : index
      %c0_12 = arith.constant 0 : index
      %13 = vector.load %arg7[%c0_11, %c0_12] : memref<16x32xf32, #tpu.memory_space<vmem>>, vector<16x32xf32>
      tpu.vector_store %arg7[%c0_11, %c0_12], %12 {strides = array<i32>} : memref<16x32xf32, #tpu.memory_space<vmem>>, vector<16x32xf32>,
    } else {
    }
    %c0 = arith.constant 0 : index
    %c0_1 = arith.constant 0 : index
    %3 = vector.load %arg7[%c0, %c0_1] : memref<16x32xf32, #tpu.memory_space<vmem>>, vector<16x32xf32>
    %c0_2 = arith.constant 0 : index
    %c0_3 = arith.constant 0 : index
    %4 = vector.load %arg3[%c0_2, %c0_3] : memref<16x32xf32, #tpu.memory_space<vmem>>, vector<16x32xf32>
    %c0_4 = arith.constant 0 : index
    %c0_5 = arith.constant 0 : index
    %5 = vector.load %arg4[%c0_4, %c0_5] : memref<32x32xf32, #tpu.memory_space<vmem>>, vector<32x32xf32>
    %cst = arith.constant dense<0.000000e+00> : vector<16x32xf32>
    %6 = tpu.matmul %4, %5, %cst {dimension_numbers = #tpu.dot_dimension_numbers<[1], [0], [0], [1], [0, 0, 1, 1], [], []>} : vector<16x32xf32>, vector<32x32xf32>, vector<16x32xf32> -> vector<16x32xf32>
    %7 = arith.addf %3, %6 : vector<16x32xf32>
    %c0_6 = arith.constant 0 : index
    %c0_7 = arith.constant 0 : index
    %8 = vector.load %arg7[%c0_6, %c0_7] : memref<16x32xf32, #tpu.memory_space<vmem>>, vector<16x32xf32>
    tpu.vector_store %arg7[%c0_6, %c0_7], %7 {strides = array<i32>} : memref<16x32xf32, #tpu.memory_space<vmem>>, vector<16x32xf32>,
    %c0_i32_8 = arith.constant 0 : i32
    %9 = arith.cmpi eq, %arg2, %c0_i32_8 : i32
    %10 = arith.extui %9 : i1 to i32
    %c0_i32_9 = arith.constant 0 : i32
    %11 = arith.cmpi ne, %10, %c0_i32_9 : i32
    scf.if %11 {
      %c0_10 = arith.constant 0 : index
      %c0_11 = arith.constant 0 : index
      %12 = vector.load %arg7[%c0_10, %c0_11] : memref<16x32xf32, #tpu.memory_space<vmem>>, vector<16x32xf32>
      %c0_12 = arith.constant 0 : index
      %c0_13 = arith.constant 0 : index
      %13 = vector.load %arg5[%c0_12, %c0_13] : memref<1x32xf32, #tpu.memory_space<vmem>>, vector<1x32xf32>
      %14 = vector.broadcast %13 : vector<1x32xf32> to vector<16x32xf32>
      %15 = arith.addf %12, %14 : vector<16x32xf32>
      %c0_14 = arith.constant 0 : index
      %c0_15 = arith.constant 0 : index
      %16 = vector.load %arg6[%c0_14, %c0_15] : memref<16x32xf32, #tpu.memory_space<vmem>>, vector<16x32xf32>
      tpu.vector_store %arg6[%c0_14, %c0_15], %15 {strides = array<i32>} : memref<16x32xf32, #tpu.memory_space<vmem>>, vector<16x32xf32>,
    } else {
    }
    return
  }
  func.func @transform_0(%arg0: i32, %arg1: i32, %arg2: i32) -> (i32, i32) {
    %c0_i32 = arith.constant 0 : i32
    return %arg0, %arg2 : i32, i32
  }
  func.func @transform_1(%arg0: i32, %arg1: i32, %arg2: i32) -> (i32, i32) {
    %c0_i32 = arith.constant 0 : i32
    return %arg2, %arg1 : i32, i32
  }
  func.func @transform_2(%arg0: i32, %arg1: i32, %arg2: i32) -> (i32, i32) {
    %c0_i32 = arith.constant 0 : i32
    %c0_i32_0 = arith.constant 0 : i32
    return %c0_i32, %arg1 : i32, i32
  }
  func.func @transform_3(%arg0: i32, %arg1: i32, %arg2: i32) -> (i32, i32) {
    %c0_i32 = arith.constant 0 : i32
    return %arg0, %arg1 : i32, i32
  }
}

</mosaic_0001>

<bundles_post_ra>
// kernel: tpu_custom_call.1
= control target key start
LH: loop header
LB: loop body
LE: loop exit
PB: predicated region body
PF: predicated region fallthrough
CT: control target
= control target key end

     0   :  { %8 = vsyncpa [#allocation4], 0  ;;  %s366_s0 = inlined_call_operand.hbm [shape: f32[16,32], index: 0, kind: input, shape index: {}]   ;;  %s367_s1 = inlined_call_operand.hbm [shape: f32[32,32], index: 1, kind: input, shape index: {}]   ;;  %s368_s2 = inlined_call_operand.vmem [shape: f32[1,32], index: 2, kind: input, shape index: {}]   ;;  %s369_s3 = inlined_call_operand.hbm [shape: f32[16,32], index: 3, kind: output, shape index: {}]  }
   0x1   :  { %9 = vsyncpa [#allocation7], 0 }
   0x2   :  { %10 = vsyncpa [#allocation5], 0  ;;  %s284_s12 = smov [#allocation3]   ;;  %s212_s16 = scalar_lea.hbm %s366_s0, 256 }
   0x3   :  { %s16_s13 = sshll.u32 %s284_s12, 4  ;;  %p213_p0 = scmp.ne.s32.totalorder %s366_s0, %s212_s16  ;;  %s17_s13 = int_to_ptr.vmem [resolvable:$true] %s16_s13 }
   0x4   :  { %p216_p1 = scmp.lt.u32.totalorder %s212_s16, %s366_s0 }
   0x6   :  { %p218_p2 = pnand %p216_p1, %p213_p0 }
   0x8   :  { %221 = shalt.err (!%p218_p2)
}
   0x9   :  { %s222_s21 = scalar_lea.vmem %s17_s13, 256  ;;  %p227_p4 = scmp.lt.s32.totalorder %s17_s13, %s17_s13 }
   0xa   :  { %p223_p3 = scmp.ne.s32.totalorder %s17_s13, %s222_s21  ;;  %p228_p5 = scmp.lt.s32.totalorder %s222_s21, %s222_s21 }
   0xc   :  { %p229_p6 = por %p228_p5, %p227_p4 }
   0xe   :  { %p230_p7 = pnand %p229_p6, %p223_p3 }
  0x10   :  { %233 = shalt.err (!%p230_p7)
}
  0x11   :  { %s285_s22 = smov 128   ;;  %s286_s23 = smov 8  }
  0x12   :  { %22 = dma.hbm_to_vmem [thread:$0]  %s366_s0, 256, %s17_s13, [#allocation4], %s285_s22, %s285_s22, %s286_s23  }
  0x13   :  { %s287_s26 = smov [#allocation6]   ;;  %s234_s30 = scalar_lea.hbm %s367_s1, 512 }
  0x14   :  { %s28_s27 = sshll.u32 %s287_s26, 4  ;;  %p235_p8 = scmp.ne.s32.totalorder %s367_s1, %s234_s30  ;;  %s29_s27 = int_to_ptr.vmem [resolvable:$true] %s28_s27 }
  0x15   :  { %p238_p9 = scmp.lt.u32.totalorder %s234_s30, %s367_s1 }
  0x17   :  { %p240_p10 = pnand %p238_p9, %p235_p8 }
  0x19   :  { %243 = shalt.err (!%p240_p10)
}
  0x1a   :  { %s244_s8 = scalar_lea.vmem %s29_s27, 512  ;;  %p249_p12 = scmp.lt.s32.totalorder %s29_s27, %s29_s27 }
  0x1b   :  { %p245_p11 = scmp.ne.s32.totalorder %s29_s27, %s244_s8  ;;  %p250_p13 = scmp.lt.s32.totalorder %s244_s8, %s244_s8 }
  0x1d   :  { %p251_p0 = por %p250_p13, %p249_p12 }
  0x1f   :  { %p252_p1 = pnand %p251_p0, %p245_p11 }
  0x21   :  { %255 = shalt.err (!%p252_p1)
}
  0x22   :  { %34 = dma.hbm_to_vmem [thread:$0]  %s367_s1, 512, %s29_s27, [#allocation7], %s285_s22, %s285_s22, %s286_s23  }
  0x23   :  { %278 = dma.done.wait [#allocation4], 256  }
  0x24   :  { %279 = vsyncadd [#allocation4], 4294967040 }
  0x25   :  { %280 = dma.done.wait [#allocation7], 512  }
  0x26   :  { %281 = vsyncadd [#allocation7], 4294966784  ;;  %vm47_vm0 = vcmask 261120   ;;  %v288_v0 = vmov 0.0   ;;  %v54_v1 = vld [vmem:[#allocation6] sm:$0xff]  ;;  %v55_v2 = vld [vmem:[#allocation6 + $0x8] sm:$0xff] }
  0x27   :  { %49 = vst.msk [vmem:[#allocation2 + $0x8] sm:$0xff] %vm47_vm0, %v288_v0  ;;  %48 = vst.msk [vmem:[#allocation2] sm:$0xff] %vm47_vm0, %v288_v0  ;;  %v56_v3 = vld [vmem:[#allocation6 + $0x10] sm:$0xff]  ;;  %v198_v4 = vpack.c.bf16 %v55_v2, %v54_v1  ;;  %v57_v5 = vld [vmem:[#allocation6 + $0x18] sm:$0xff]  ;;  %s289_s11 = smov [#allocation8]  }
  0x28   :  { %v52_v6 = vld [vmem:[#allocation3] sm:$0xff]  ;;  %v202_v7 = vpack.c.bf16 %v57_v5, %v56_v3  ;;  %v53_v8 = vld [vmem:[#allocation3 + $0x8] sm:$0xff]  ;;  %v180_v15 = vld [vmem:[%s368_s2] ss:$0 sm:$0xff]  ;;  %s165_s12 = sshll.u32 %s289_s11, 4  ;;  %s166_s12 = int_to_ptr.vmem [resolvable:$true] %s165_s12 }
  0x29   :  { %195 = vmatprep.mubr.msk.f32.mxu0 %vm47_vm0, %v52_v6  ;;  %199 = vmatprep.subr.bf16.mxu0 %v198_v4  ;;  %s256_s13 = scalar_lea.vmem %s166_s12, 256  ;;  %p261_p3 = scmp.lt.s32.totalorder %s166_s12, %s166_s12 }
  0x2a   :  { %201 = vmatpush3.bf16.msra.mxu0 %v198_v4  ;;  %p257_p2 = scmp.ne.s32.totalorder %s166_s12, %s256_s13  ;;  %p262_p4 = scmp.lt.s32.totalorder %s256_s13, %s256_s13 }
  0x2b   :  { %203 = vmatprep.subr.bf16.mxu0 %v202_v7 }
  0x2c   :  { %p263_p5 = por %p262_p4, %p261_p3 }
  0x2e   :  { %205 = vmatpush3.bf16.msra.mxu0 %v202_v7  ;;  %v51_v9 = vld [vmem:[#allocation2 + $0x8] sm:$0xff]  ;;  %v50_v10 = vld [vmem:[#allocation2] sm:$0xff]  ;;  %p264_p6 = pnand %p263_p5, %p257_p2 }
  0x31   :  { %196 = vmatmul.mubr.msk.f32.vlgmr.msra.gmra.mrb[0].mxu0 %vm47_vm0, %v53_v8 }
 0x104   :  { %v197_v11 = vpop.f32.mrb[0].mxu0 }
 0x105   :  { %v141_v12 = vadd.f32 %v197_v11, %v51_v9  ;;  %v131_v13 = vpop.f32.mrb[1].mxu0 }
 0x106   :  { %v140_v14 = vadd.f32 %v131_v13, %v50_v10 }
 0x107   :  { %143 = vst.msk [vmem:[#allocation2 + $0x8] sm:$0xff] %vm47_vm0, %v141_v12 }
 0x108   :  { %142 = vst.msk [vmem:[#allocation2] sm:$0xff] %vm47_vm0, %v140_v14 }
 0x10e   :  { %v148_v16 = vld [vmem:[#allocation2 + $0x8] sm:$0xff] }
 0x10f   :  { %v147_v17 = vld [vmem:[#allocation2] sm:$0xff]  ;;  %v157_v18 = vadd.f32 %v180_v15, %v148_v16 }
 0x110   :  { %v156_v19 = vadd.f32 %v180_v15, %v147_v17 }
 0x111   :  { %159 = vst.msk [vmem:[#allocation8 + $0x8] sm:$0xff] %vm47_vm0, %v157_v18 }
 0x112   :  { %158 = vst.msk [vmem:[#allocation8] sm:$0xff] %vm47_vm0, %v156_v19 }
 0x113   :  { %267 = shalt.err (!%p264_p6)
}
 0x114   :  { %s268_s15 = scalar_lea.hbm %s369_s3, 256 }
 0x115   :  { %p269_p7 = scmp.ne.s32.totalorder %s369_s3, %s268_s15  ;;  %p272_p8 = scmp.lt.u32.totalorder %s268_s15, %s369_s3 }
 0x117   :  { %p274_p9 = pnand %p272_p8, %p269_p7 }
 0x119   :  { %277 = shalt.err (!%p274_p9)
}
 0x11a   :  { %171 = dma.vmem_to_hbm [thread:$0]  %s166_s12, 256, %s369_s3, [#allocation5], %s285_s22, %s285_s22, %s286_s23  }
 0x11b   :  { %282 = dma.done.wait [#allocation5], 256  }
 0x11c   :  { %283 = vsyncadd [#allocation5], 4294967040 }
 0x11d   :  { %175 = vsyncpa [#allocation4], 1 }
 0x11e   :  { %176 = vsyncpa [#allocation7], 1 }
 0x11f   :  { %177 = vsyncpa [#allocation5], 1 }

</bundles_post_ra>
